<compile_context>
chip_gen: v6e
topology: v6e:2x2x1
jax: 0.10.0
libtpu: 0.0.40
codegen_flags: <defaults>
</compile_context>

<pallas_src>
import jax
import jax.numpy as jnp
from jax.experimental import pallas as pl
from jax.experimental.pallas import tpu as pltpu


def cbam_kernel(x_ref, w1t_ref, w2t_ref, m_ref, out_ref):
    # x_ref block: (Bt, C, HW) f32, lane-dense (HW multiple of 128).
    x = x_ref[...]
    Bt, C, HW = x.shape

    # ---- channel attention -------------------------------------------------
    inv_hw = 1.0 / float(HW)
    avg_c = jnp.sum(x, axis=-1) * inv_hw            # (Bt, C) == AdaptiveAvgPool2d(1)
    max_c = jnp.max(x, axis=-1)                     # (Bt, C) == AdaptiveMaxPool2d(1)

    # Fused shared MLP: one (2*Bt, C) batch instead of four M=1 matmuls.
    pooled = jnp.concatenate([avg_c, max_c], axis=0)                      # (2*Bt, C)
    h = jnp.dot(pooled, w1t_ref[...], preferred_element_type=jnp.float32)  # (2*Bt, Cr)
    h = jnp.maximum(h, 0.0)                                                # ReLU
    mlp = jnp.dot(h, w2t_ref[...], preferred_element_type=jnp.float32)     # (2*Bt, C)
    ca = jax.nn.sigmoid(mlp[:Bt] + mlp[Bt:])                               # (Bt, C)

    x_ca = x * ca[:, :, None]                        # broadcast over H*W (lanes)

    # ---- spatial attention -------------------------------------------------
    avg_sp = jnp.mean(x_ca, axis=1)                  # (Bt, HW)  mean over channels
    max_sp = jnp.max(x_ca, axis=1)                   # (Bt, HW)  max over channels

    # 7x7 SAME conv (in=2 [avg,max], out=1, no bias) expressed as two matmuls
    # against precomputed (HW, HW) conv operators -> stays lane-dense, MXU work.
    logits = (jnp.dot(avg_sp, m_ref[0], preferred_element_type=jnp.float32)
              + jnp.dot(max_sp, m_ref[1], preferred_element_type=jnp.float32))
    sa = jax.nn.sigmoid(logits)                      # (Bt, HW)

    out_ref[...] = (x_ca * sa[:, None, :]).astype(out_ref.dtype)


def build_conv_operators(wconv, H, W):
    """wconv: (1, 2, k, k) -> M: (2, H*W, H*W) such that for row-major flattened
    spatial maps a, m (shape (H*W,)):  conv2d_SAME([a; m]) == a @ M[0] + m @ M[1]."""
    k = wconv.shape[-1]
    pad = k // 2
    dh = jnp.arange(H)[:, None] - jnp.arange(H)[None, :] + pad    # (Hi, Ho)
    dw = jnp.arange(W)[:, None] - jnp.arange(W)[None, :] + pad    # (Wi, Wo)
    valid = ((dh >= 0) & (dh < k))[:, :, None, None] & ((dw >= 0) & (dw < k))[None, None, :, :]
    dh_c = jnp.clip(dh, 0, k - 1)
    dw_c = jnp.clip(dw, 0, k - 1)
    w = wconv[0]                                                  # (2, k, k)
    # full[c, hi, ho, wi, wo] = w[c, hi-ho+pad, wi-wo+pad] (0 outside the kernel window)
    full = w[:, dh_c[:, :, None, None], dw_c[None, None, :, :]]   # (2, H, H, W, W)
    full = full * valid.astype(w.dtype)[None]
    # -> (c, hi, wi, ho, wo) -> (2, H*W, H*W)
    return jnp.transpose(full, (0, 1, 3, 2, 4)).reshape(2, H * W, H * W)


def cbam_pallas(x, w1, w2, wconv, *, block_b=None):
    """x: (B, C, H, W) f32. w1: (Cr, C), w2: (C, Cr), wconv: (1, 2, k, k)."""
    B, C, H, W = x.shape
    HW = H * W
    Cr = w1.shape[0]

    x_flat = x.reshape(B, C, HW)                     # free view: H*W contiguous per channel
    w1t = jnp.transpose(w1)                          # (C, Cr)
    w2t = jnp.transpose(w2)                          # (Cr, C)
    conv_m = build_conv_operators(wconv, H, W).astype(jnp.float32)   # (2, HW, HW)

    # Batch elements per grid step: as many as a conservative VMEM budget allows
    # (in+out double-buffered).  Note: v5e default scoped VMEM is 16 MiB and v7x
    # physical VMEM is 64 MiB -- keep the budget small or raise vmem_limit_bytes
    # explicitly when scaling to production shapes.
    if block_b is None:
        bytes_per_b = C * HW * x.dtype.itemsize
        block_b = max(1, min(B, (8 * 1024 * 1024) // (4 * bytes_per_b)))
    while B % block_b != 0:
        block_b -= 1
    Bt = block_b

    out_flat = pl.pallas_call(
        cbam_kernel,
        out_shape=jax.ShapeDtypeStruct((B, C, HW), x.dtype),
        grid_spec=pltpu.PrefetchScalarGridSpec(
            num_scalar_prefetch=0,
            grid=(B // Bt,),
            in_specs=[
                pl.BlockSpec((Bt, C, HW), lambda b: (b, 0, 0)),
                pl.BlockSpec((C, Cr), lambda b: (0, 0)),
                pl.BlockSpec((Cr, C), lambda b: (0, 0)),
                pl.BlockSpec((2, HW, HW), lambda b: (0, 0, 0)),
            ],
            out_specs=pl.BlockSpec((Bt, C, HW), lambda b: (b, 0, 0)),
        ),
        compiler_params=pltpu.CompilerParams(
            dimension_semantics=("parallel",)),   # batch blocks are independent
    )(x_flat, w1t, w2t, conv_m)
    return out_flat.reshape(B, C, H, W)


def cbam_reference(x, w1, w2, wconv):
    """Pure-JAX reference mirroring the PyTorch forward."""
    avg_c = jnp.mean(x, axis=(2, 3))
    max_c = jnp.max(x, axis=(2, 3))

    def mlp(v):
        return jnp.maximum(v @ w1.T, 0.0) @ w2.T

    ca = jax.nn.sigmoid(mlp(avg_c) + mlp(max_c))[:, :, None, None]
    x = x * ca
    avg_sp = jnp.mean(x, axis=1, keepdims=True)
    max_sp = jnp.max(x, axis=1, keepdims=True)
    cat = jnp.concatenate([avg_sp, max_sp], axis=1)
    sa = jax.lax.conv_general_dilated(
        cat, wconv, window_strides=(1, 1), padding="SAME",
        dimension_numbers=("NCHW", "OIHW", "NCHW"))
    sa = jax.nn.sigmoid(sa)
    return x * sa


if __name__ == "__main__":
    # Small shapes consistent with the module defaults (reduction_ratio=16, k=7).
    B, C, H, W = 4, 32, 16, 16
    reduction_ratio, ksize = 16, 7
    Cr = C // reduction_ratio

    key = jax.random.PRNGKey(0)
    kx, k1, k2, kc = jax.random.split(key, 4)
    x = jax.random.normal(kx, (B, C, H, W), dtype=jnp.float32)
    # Deterministic synthetic parameters (nn.Linear / nn.Conv2d weight shapes).
    w1 = jax.random.normal(k1, (Cr, C), dtype=jnp.float32) * 0.1     # Linear(C -> Cr), no bias
    w2 = jax.random.normal(k2, (C, Cr), dtype=jnp.float32) * 0.1     # Linear(Cr -> C), no bias
    wconv = jax.random.normal(kc, (1, 2, ksize, ksize), dtype=jnp.float32) * 0.1  # Conv2d(2->1, k=7)

    # block_b=2 -> grid=(2,): exercises batching-per-step AND the pipelined grid.
    out = jax.block_until_ready(cbam_pallas(x, w1, w2, wconv, block_b=2))
    ref = jax.block_until_ready(cbam_reference(x, w1, w2, wconv))

    assert out.shape == ref.shape == (B, C, H, W)
    max_err = float(jnp.max(jnp.abs(out - ref)))
    assert jnp.allclose(out, ref, atol=1e-4, rtol=1e-4), max_err

    print("KERNEL_OK")
</pallas_src>

<mosaic_0001>
module attributes {stable_mosaic.version = 11 : i64} {
  func.func @cbam_kernel(%arg0: i32, %arg1: memref<2x32x256xf32, #tpu.memory_space<vmem>>, %arg2: memref<32x2xf32, #tpu.memory_space<vmem>>, %arg3: memref<2x32xf32, #tpu.memory_space<vmem>>, %arg4: memref<2x256x256xf32, #tpu.memory_space<vmem>>, %arg5: memref<2x32x256xf32, #tpu.memory_space<vmem>>) attributes {dimension_semantics = [#tpu.dimension_semantics<parallel>], iteration_bounds = array<i64: 2>, scalar_prefetch = 0 : i64, scratch_operands = 0 : i64, tpu.core_type = #tpu.core_type<tc>, window_params = [{transform_indices = @transform_0, window_bounds = array<i64: 2, 32, 256>}, {pipeline_mode = #tpu.pipeline_mode<synchronous>, transform_indices = @transform_1, window_bounds = array<i64: 32, 2>}, {pipeline_mode = #tpu.pipeline_mode<synchronous>, transform_indices = @transform_2, window_bounds = array<i64: 2, 32>}, {pipeline_mode = #tpu.pipeline_mode<synchronous>, transform_indices = @transform_3, window_bounds = array<i64: 2, 256, 256>}, {transform_indices = @transform_4, window_bounds = array<i64: 2, 32, 256>}]} {
    %c0 = arith.constant 0 : index
    %c0_0 = arith.constant 0 : index
    %c0_1 = arith.constant 0 : index
    %0 = vector.load %arg1[%c0, %c0_0, %c0_1] : memref<2x32x256xf32, #tpu.memory_space<vmem>>, vector<2x32x256xf32>
    %cst = arith.constant dense<0.000000e+00> : vector<2x32xf32>
    %1 = vector.multi_reduction <add>, %0, %cst [2] : vector<2x32x256xf32> to vector<2x32xf32>
    %cst_2 = arith.constant 3.906250e-03 : f32
    %2 = vector.broadcast %cst_2 : f32 to vector<2x32xf32>
    %3 = arith.mulf %1, %2 : vector<2x32xf32>
    %cst_3 = arith.constant dense<0xFF800000> : vector<2x32xf32>
    %4 = vector.multi_reduction <maximumf>, %0, %cst_3 [2] : vector<2x32x256xf32> to vector<2x32xf32>
    %5 = tpu.concatenate %3, %4 in 0 : vector<2x32xf32>, vector<2x32xf32> -> vector<4x32xf32>
    %c0_4 = arith.constant 0 : index
    %c0_5 = arith.constant 0 : index
    %6 = vector.load %arg2[%c0_4, %c0_5] : memref<32x2xf32, #tpu.memory_space<vmem>>, vector<32x2xf32>
    %cst_6 = arith.constant dense<0.000000e+00> : vector<4x2xf32>
    %7 = tpu.matmul %5, %6, %cst_6 {dimension_numbers = #tpu.dot_dimension_numbers<[1], [0], [0], [1], [0, 0, 1, 1], [], []>} : vector<4x32xf32>, vector<32x2xf32>, vector<4x2xf32> -> vector<4x2xf32>
    %cst_7 = arith.constant 0.000000e+00 : f32
    %8 = vector.broadcast %cst_7 : f32 to vector<4x2xf32>
    %9 = arith.maximumf %7, %8 : vector<4x2xf32>
    %c0_8 = arith.constant 0 : index
    %c0_9 = arith.constant 0 : index
    %10 = vector.load %arg3[%c0_8, %c0_9] : memref<2x32xf32, #tpu.memory_space<vmem>>, vector<2x32xf32>
    %cst_10 = arith.constant dense<0.000000e+00> : vector<4x32xf32>
    %11 = tpu.matmul %9, %10, %cst_10 {dimension_numbers = #tpu.dot_dimension_numbers<[1], [0], [0], [1], [0, 0, 1, 1], [], []>} : vector<4x2xf32>, vector<2x32xf32>, vector<4x32xf32> -> vector<4x32xf32>
    %12 = vector.extract_strided_slice %11 {offsets = [0, 0], sizes = [2, 32], strides = [1, 1]} : vector<4x32xf32> to vector<2x32xf32>
    %13 = vector.extract_strided_slice %11 {offsets = [2, 0], sizes = [2, 32], strides = [1, 1]} : vector<4x32xf32> to vector<2x32xf32>
    %14 = arith.addf %12, %13 : vector<2x32xf32>
    %15 = arith.negf %14 : vector<2x32xf32>
    %16 = math.exp %15 : vector<2x32xf32>
    %cst_11 = arith.constant 1.000000e+00 : f32
    %17 = vector.broadcast %cst_11 : f32 to vector<2x32xf32>
    %18 = arith.addf %17, %16 : vector<2x32xf32>
    %19 = arith.divf %17, %18 : vector<2x32xf32>
    %20 = vector.shape_cast %19 : vector<2x32xf32> to vector<2x32x1xf32>
    %21 = vector.broadcast %20 : vector<2x32x1xf32> to vector<2x32x256xf32>
    %22 = arith.mulf %0, %21 : vector<2x32x256xf32>
    %cst_12 = arith.constant dense<0.000000e+00> : vector<2x256xf32>
    %23 = vector.multi_reduction <add>, %22, %cst_12 [1] : vector<2x32x256xf32> to vector<2x256xf32>
    %cst_13 = arith.constant 3.200000e+01 : f32
    %24 = vector.broadcast %cst_13 : f32 to vector<2x256xf32>
    %25 = arith.divf %23, %24 : vector<2x256xf32>
    %cst_14 = arith.constant dense<0xFF800000> : vector<2x256xf32>
    %26 = vector.multi_reduction <maximumf>, %22, %cst_14 [1] : vector<2x32x256xf32> to vector<2x256xf32>
    %c0_15 = arith.constant 0 : index
    %c0_16 = arith.constant 0 : index
    %c0_17 = arith.constant 0 : index
    %27 = vector.load %arg4[%c0_15, %c0_16, %c0_17] : memref<2x256x256xf32, #tpu.memory_space<vmem>>, vector<1x256x256xf32>
    %28 = vector.shape_cast %27 : vector<1x256x256xf32> to vector<256x256xf32>
    %cst_18 = arith.constant dense<0.000000e+00> : vector<2x256xf32>
    %29 = tpu.matmul %25, %28, %cst_18 {dimension_numbers = #tpu.dot_dimension_numbers<[1], [0], [0], [1], [0, 0, 1, 1], [], []>} : vector<2x256xf32>, vector<256x256xf32>, vector<2x256xf32> -> vector<2x256xf32>
    %c1 = arith.constant 1 : index
    %c0_19 = arith.constant 0 : index
    %c0_20 = arith.constant 0 : index
    %30 = vector.load %arg4[%c1, %c0_19, %c0_20] : memref<2x256x256xf32, #tpu.memory_space<vmem>>, vector<1x256x256xf32>
    %31 = vector.shape_cast %30 : vector<1x256x256xf32> to vector<256x256xf32>
    %cst_21 = arith.constant dense<0.000000e+00> : vector<2x256xf32>
    %32 = tpu.matmul %26, %31, %cst_21 {dimension_numbers = #tpu.dot_dimension_numbers<[1], [0], [0], [1], [0, 0, 1, 1], [], []>} : vector<2x256xf32>, vector<256x256xf32>, vector<2x256xf32> -> vector<2x256xf32>
    %33 = arith.addf %29, %32 : vector<2x256xf32>
    %34 = arith.negf %33 : vector<2x256xf32>
    %35 = math.exp %34 : vector<2x256xf32>
    %cst_22 = arith.constant 1.000000e+00 : f32
    %36 = vector.broadcast %cst_22 : f32 to vector<2x256xf32>
    %37 = arith.addf %36, %35 : vector<2x256xf32>
    %38 = arith.divf %36, %37 : vector<2x256xf32>
    %39 = vector.shape_cast %38 : vector<2x256xf32> to vector<2x1x256xf32>
    %40 = vector.broadcast %39 : vector<2x1x256xf32> to vector<2x32x256xf32>
    %41 = arith.mulf %22, %40 : vector<2x32x256xf32>
    %c0_23 = arith.constant 0 : index
    %c0_24 = arith.constant 0 : index
    %c0_25 = arith.constant 0 : index
    %42 = vector.load %arg5[%c0_23, %c0_24, %c0_25] : memref<2x32x256xf32, #tpu.memory_space<vmem>>, vector<2x32x256xf32>
    tpu.vector_store %arg5[%c0_23, %c0_24, %c0_25], %41 {strides = array<i32>} : memref<2x32x256xf32, #tpu.memory_space<vmem>>, vector<2x32x256xf32>,
    return
  }
  func.func @transform_0(%arg0: i32) -> (i32, i32, i32) {
    %c0_i32 = arith.constant 0 : i32
    %c0_i32_0 = arith.constant 0 : i32
    %c0_i32_1 = arith.constant 0 : i32
    return %arg0, %c0_i32, %c0_i32_0 : i32, i32, i32
  }
  func.func @transform_1(%arg0: i32) -> (i32, i32) {
    %c0_i32 = arith.constant 0 : i32
    %c0_i32_0 = arith.constant 0 : i32
    %c0_i32_1 = arith.constant 0 : i32
    return %c0_i32, %c0_i32_0 : i32, i32
  }
  func.func @transform_2(%arg0: i32) -> (i32, i32) {
    %c0_i32 = arith.constant 0 : i32
    %c0_i32_0 = arith.constant 0 : i32
    %c0_i32_1 = arith.constant 0 : i32
    return %c0_i32, %c0_i32_0 : i32, i32
  }
  func.func @transform_3(%arg0: i32) -> (i32, i32, i32) {
    %c0_i32 = arith.constant 0 : i32
    %c0_i32_0 = arith.constant 0 : i32
    %c0_i32_1 = arith.constant 0 : i32
    %c0_i32_2 = arith.constant 0 : i32
    return %c0_i32, %c0_i32_0, %c0_i32_1 : i32, i32, i32
  }
  func.func @transform_4(%arg0: i32) -> (i32, i32, i32) {
    %c0_i32 = arith.constant 0 : i32
    %c0_i32_0 = arith.constant 0 : i32
    %c0_i32_1 = arith.constant 0 : i32
    return %arg0, %c0_i32, %c0_i32_0 : i32, i32, i32
  }
}

</mosaic_0001>

<bundles_post_ra>
// kernel: tpu_custom_call.1
= control target key start
LH: loop header
LB: loop body
LE: loop exit
PB: predicated region body
PF: predicated region fallthrough
CT: control target
= control target key end

     0   :  { %9 = vsyncpa [#allocation3], 0  ;;  %s1890_s0 = inlined_call_operand.hbm [shape: f32[4,32,256], index: 0, kind: input, shape index: {}]   ;;  %s1891_s1 = inlined_call_operand.vmem [shape: f32[32,2], index: 1, kind: input, shape index: {}]   ;;  %s1892_s2 = inlined_call_operand.vmem [shape: f32[2,32], index: 2, kind: input, shape index: {}]   ;;  %s1893_s3 = inlined_call_operand.hbm [shape: f32[2,256,256], index: 3, kind: input, shape index: {}]   ;;  %s1894_s4 = inlined_call_operand.hbm [shape: f32[4,32,256], index: 4, kind: output, shape index: {}]  }
   0x1   :  { %11 = vsyncpa [#allocation3 + $0x1], 0 }
   0x2   :  { %12 = vsyncpa [#allocation6], 0 }
   0x3   :  { %13 = vsyncpa [#allocation4], 0 }
   0x4   :  { %15 = vsyncpa [#allocation4 + $0x1], 0  ;;  %s1472_s15 = smov 0   ;;  %s1474_s16 = smov 0  }
   0x5   :  { %s1476_s17 = smov 0   ;;  %s1478_s18 = smov 0  }
   0x6 LB: > { %s1493_s19 = sadd.s32 4294967295, %s1435_s18   ;;  %s1186_s20 = sadd.s32 4294967294, %s1435_s18   ;;  %s1435_s18 = sphi %s1478_s18, %s1916_s18   ;;  %s1431_s17 = sphi %s1476_s17, %s1915_s17   ;;  %s1427_s16 = sphi %s1474_s16, %s1914_s16   ;;  %s1423_s15 = sphi %s1472_s15, %s1913_s15  }
   0x7   : > { %p41_p0 = scmp.ne.s32.totalorder %s1427_s16, %s1423_s15  ;;  %p1895_p1 = scmp.eq.s32.totalorder %s1493_s19, 0 }
   0x8   : > { %p134_p3 = scmp.eq.s32.totalorder %s1186_s20, 1  ;;  %p1187_p5 = scmp.ge.s32.totalorder %s1435_s18, 1 }
   0x9   : > { %p1502_p4 = por %p1895_p1, %p41_p0  ;;  %p141_p7 = scmp.lt.s32.totalorder %s1435_s18, 3 }
   0xa   : > { %p1507_p6 = por %p134_p3, %p41_p0  ;;  %s1437_s24 = smov [#allocation5]  }
   0xb   : > { %s1899_s21 = scalar_select %p1502_p4, 1, 0 }
   0xc   : > { %s1900_s22 = scalar_select %p1507_p6, 1, 0 }
   0xd   : > { %p1512_p8 = pnand %p1187_p5, %p141_p7  ;;  %s159_s25 = sshll.u32 %s1437_s24, 4  ;;  %s160_s25 = int_to_ptr.vmem [resolvable:$true] %s159_s25 }
   0xe   : > { %s1526_s27 = sadd.s32 1, %s1435_s18   ;;  %s28_s28 = sadd.s32 1, %s1431_s17 }
   0xf   : > { %s1901_s23 = scalar_select %p1512_p8, 1, 0 }
  0x10   : > { %p1245_p9 = pneg %p1512_p8  ;;  %s25_s29 = ssub.s32 %s1435_s18, %s1526_s27 }
  0x11   : > { %s1324_s30 = scalar_lea.vmem %s160_s25, 16384  ;;  %p1332_p5 = scmp.lt.s32.totalorder %s160_s25, %s160_s25 }
  0x12   : > { %p1521_p11 = pnand %p1245_p9, %p1895_p1  ;;  %p1325_p13 = scmp.ne.s32.totalorder %s160_s25, %s1324_s30 }
  0x13   : > { %p1333_p7 = scmp.lt.s32.totalorder %s1324_s30, %s1324_s30 }
  0x14   : > { %p1315_p12 = pneg %p1521_p11 }
  0x15   : > { %p1334_p10 = por %p1333_p7, %p1332_p5 }
  0x16   : > { %p1327_p0 = pnand %p1325_p13, %p1315_p12 }
  0x18   : > { %p1328_p3 = pneg %p1327_p0 }
  0x1a   : > { %p1335_p2 = pnand %p1334_p10, %p1328_p3 }
  0x1c   : > { %1338 = shalt.err (!%p1335_p2)
}
  0x1d   : > { %s1438_s5 = smov 256   ;;  %s1439_s6 = smov 16  }
  0x1e   : > { %1248 = dma.hbm_to_vmem [thread:$0]  (!%p1521_p11), %s1893_s3, 16384, %s160_s25, [#allocation6], %s1438_s5, %s1438_s5, %s1439_s6  }
  0x1f   : > { %p26_p2 = scmp.eq.s32.totalorder %s25_s29, 0  ;;  %p35_p9 = scmp.ne.s32.totalorder %s1431_s17, %s1427_s16 }
  0x20   : > { %p36_p10 = scmp.eq.s32.totalorder %s1435_s18, 0  ;;  %p1258_p12 = scmp.lt.s32.totalorder %s1435_s18, 2 }
  0x21   : > { %s1546_s9 = scalar_select %p26_p2, %s1431_s17, %s28_s28  }
  0x22   : > { %p37_p13 = por %p36_p10, %p35_p9  ;;  %p1903_p0 = scmp.eq.s32.totalorder %s1493_s19, 1 }
  0x23   : > { %s173_s11 = sand.u32 1, %s1431_s17   ;;  %s1211_s12 = sshll.u32 %s1435_s18, 11 }
  0x24   : > { %p1550_p3 = por %p1903_p0, %p35_p9  ;;  %s1190_s13 = sshll.u32 %s173_s11, 7 }
  0x25   : > { %s1559_s24 = scalar_lea.hbm %s1890_s0, %s1211_s12  ;;  %s177_s25 = scalar_lea.vmem [#allocation2], %s1190_s13 }
  0x26   : > { %s1904_s10 = scalar_select %p1550_p3, 1, 0 }
  0x27   : > { %s185_s26 = sshll.u32 %s177_s25, 4  ;;  %p1561_p11 = pnand %p1258_p12, %p37_p13  ;;  %s1565_s26 = int_to_ptr.vmem [resolvable:$true] %s185_s26 }
  0x28   : > { %s1567_s29 = scalar_lea.sflag [#allocation3], %s173_s11  ;;  %s1339_s30 = scalar_lea.hbm %s1559_s24, 2048 }
  0x29   : > { %p1340_p5 = scmp.ne.s32.totalorder %s1559_s24, %s1339_s30  ;;  %p1341_p7 = pneg %p1561_p11 }
  0x2a   : > { %s1344_s12 = scalar_lea.hbm %s1890_s0, 4096  ;;  %p1345_p10 = scmp.lt.s32.totalorder %s1559_s24, %s1890_s0 }
  0x2b   : > { %p1342_p2 = pnand %p1341_p7, %p1340_p5  ;;  %p1346_p12 = scmp.lt.s32.totalorder %s1344_s12, %s1339_s30 }
  0x2d   : > { %p1343_p9 = pneg %p1342_p2  ;;  %p1347_p13 = por %p1346_p12, %p1345_p10 }
  0x2f   : > { %p1348_p0 = pnand %p1347_p13, %p1343_p9 }
  0x31   : > { %1351 = shalt.err (!%p1348_p0)
}
  0x32   : > { %s1352_s11 = scalar_lea.vmem %s1565_s26, 2048  ;;  %s1440_s20 = smov [#allocation2]  }
  0x33   : > { %p1353_p1 = scmp.ne.s32.totalorder %s1565_s26, %s1352_s11  ;;  %s1357_s25 = sshll.u32 %s1440_s20, 4  ;;  %s1358_s25 = int_to_ptr.vmem [resolvable:$false] %s1357_s25 }
  0x34   : > { %s1359_s7 = scalar_lea.vmem %s1358_s25, 4096  ;;  %p1360_p2 = scmp.lt.s32.totalorder %s1565_s26, %s1358_s25 }
  0x35   : > { %p1355_p6 = pnand %p1353_p1, %p1341_p7  ;;  %p1361_p3 = scmp.lt.s32.totalorder %s1359_s7, %s1352_s11 }
  0x37   : > { %p1356_p5 = pneg %p1355_p6  ;;  %p1362_p4 = por %p1361_p3, %p1360_p2 }
  0x39   : > { %p1363_p8 = pnand %p1362_p4, %p1356_p5 }
  0x3b   : > { %1366 = shalt.err (!%p1363_p8)
}
  0x3c   : > { %1252 = dma.hbm_to_vmem [thread:$0]  (!%p1561_p11), %s1559_s24, 2048, %s1565_s26, %s1567_s29, %s1438_s5, %s1438_s5, %s1439_s6  }
  0x3d   : > { %p1906_p1 = scmp.ne.s32.totalorder %s1901_s23, 0 }
  0x3e   : > { %s1594_s30 = sand.u32 (!%p1906_p1), 1, %s1427_s16   ;;  %p1907_p4 = scmp.ne.s32.totalorder (!%p1906_p1), %s1899_s21, 0 }
  0x3f   : > { %197 = sbr.rel (%p1906_p1) target bundleno = 1085 (0x43d), region = 36  ;;  %s1195_s8 = sshll.u32 (!%p1906_p1), %s1594_s30, 7 }
  0x40   : > { %s200_s12 = scalar_lea.sflag (!%p1906_p1), [#allocation3], %s1594_s30  ;;  %s203_s28 = scalar_lea.vmem (!%p1906_p1), [#allocation2], %s1195_s8 }
  0x44   : > { %1410 = dma.done.wait (%p1907_p4), %s200_s12, 2048  }
  0x45   : > { %1412 = vsyncadd (%p1907_p4), %s200_s12, 4294965248  ;;  %p1908_p6 = scmp.eq.s32.totalorder %s1493_s19, 0 }
  0x47   : > { %1414 = dma.done.wait (%p1908_p6), [#allocation6], 16384   ;;  %p1909_p8 = pmov %p1908_p6 }
  0x48   : > { %v1608_v0 = vld [vmem:[%s203_s28 + $0x40] sm:$0xff]  ;;  %v1610_v1 = vld [vmem:[%s203_s28 + $0x48] sm:$0xff]  ;;  %v1618_v5 = vld [vmem:[%s203_s28 + $0x50] sm:$0xff]  ;;  %v1441_v32 = vmov 0.0   ;;  %vm1442_vm0 = vmmov 0   ;;  %v314_v42 = vlaneseq  ;;  %vm325_vm1 = vcmask 130112  }
  0x49   : > { %1416 = vsyncadd (%p1909_p8), [#allocation6], 4294950912  ;;  %v1612_v2 = vld [vmem:[%s203_s28] sm:$0xff]  ;;  %v262_v3 = vadd.f32 %v1610_v1, %v1608_v0  ;;  %v1616_v4 = vld [vmem:[%s203_s28 + $0x8] sm:$0xff]  ;;  %v294_v27 = vmax.f32 %v1608_v0, %v1610_v1  ;;  %1221 = vmatprep.subr.mxu0 %v1441_v32  ;;  %1232 = vmatprep.subr.mxu1 %v1441_v32  ;;  %vm332_vm2 = vcmask 195712   ;;  %vm339_vm3 = vcmask 261312  }
  0x4a   : > { %v1620_v6 = vld [vmem:[%s203_s28 + $0x58] sm:$0xff]  ;;  %v250_v7 = vadd.f32 %v1616_v4, %v1612_v2  ;;  %v1624_v8 = vld [vmem:[%s203_s28 + $0x10] sm:$0xff]  ;;  %v1632_v12 = vld [vmem:[%s203_s28 + $0x60] sm:$0xff]  ;;  %v282_v25 = vmax.f32 %v1612_v2, %v1616_v4  ;;  %1229 = vmatprep.mubr.msk.f32.mxu0 %vm1442_vm0, %v1441_v32  ;;  %1234 = vmatprep.mubr.msk.f32.mxu1 %vm1442_vm0, %v1441_v32  ;;  %v315_v45 = vand.u32 127, %v314_v42  ;;  %v1684_v47 = vshrl.u32 %v314_v42, 7  ;;  %s1213_s20 = sshll.u32 %s1493_s19, 11 }
  0x4b   : > { %v1626_v9 = vld [vmem:[%s203_s28 + $0x18] sm:$0xff]  ;;  %263 = vadd.xlane.f32.xlu1 %v262_v3  ;;  %v265_v10 = vadd.f32 %v1620_v6, %v1618_v5  ;;  %v1634_v13 = vld [vmem:[%s203_s28 + $0x68] sm:$0xff]  ;;  %v1636_v14 = vld [vmem:[%s203_s28 + $0x20] sm:$0xff]  ;;  %v297_v26 = vmax.f32 %v1618_v5, %v1620_v6  ;;  %vm360_vm4 = vcmask 1041409   ;;  %vm409_vm5 = vcmask 1043459   ;;  %s1809_s25 = scalar_lea.vmem [#allocation7], %s1195_s8  ;;  %s1833_s12 = scalar_lea.hbm %s1894_s4, %s1213_s20 }
  0x4c   : > { %251 = vadd.xlane.f32.xlu0 %v250_v7  ;;  %v253_v11 = vadd.f32 %v1626_v9, %v1624_v8  ;;  %v1638_v15 = vld [vmem:[%s203_s28 + $0x28] sm:$0xff]  ;;  %v268_v16 = vadd.f32 %v1634_v13, %v1632_v12  ;;  %v1644_v18 = vld [vmem:[%s203_s28 + $0x70] sm:$0xff]  ;;  %v1646_v19 = vld [vmem:[%s203_s28 + $0x78] sm:$0xff]  ;;  %v285_v24 = vmax.f32 %v1624_v8, %v1626_v9  ;;  %v300_v28 = vmax.f32 %v1632_v12, %v1634_v13  ;;  %s1103_s7 = sshll.u32 %s1809_s25, 4  ;;  %p1910_p11 = scmp.ne.s32.totalorder %s1904_s10, 0  ;;  %s1835_s7 = int_to_ptr.vmem [resolvable:$true] %s1103_s7 }
  0x4d   : > { %v256_v17 = vadd.f32 %v1638_v15, %v1636_v14  ;;  %v1648_v20 = vld [vmem:[%s203_s28 + $0x30] sm:$0xff]  ;;  %v1650_v21 = vld [vmem:[%s203_s28 + $0x38] sm:$0xff]  ;;  %v271_v22 = vadd.f32 %v1646_v19, %v1644_v18  ;;  %v288_v29 = vmax.f32 %v1636_v14, %v1638_v15  ;;  %v303_v30 = vmax.f32 %v1644_v18, %v1646_v19  ;;  %v415_v35 = vld [vmem:[%s1891_s1 + $0x8] sm:$0xff]  ;;  %s1089_s28 = scalar_lea.sflag [#allocation4], %s1594_s30  ;;  %s1367_s21 = scalar_lea.vmem %s1835_s7, 2048 }
  0x4e   : > { %v259_v23 = vadd.f32 %v1650_v21, %v1648_v20  ;;  %v291_v31 = vmax.f32 %v1648_v20, %v1650_v21  ;;  %v417_v33 = vld [vmem:[%s1891_s1 + $0x18] sm:$0xff]  ;;  %v416_v34 = vld [vmem:[%s1891_s1 + $0x10] sm:$0xff]  ;;  %v414_v36 = vld [vmem:[%s1891_s1] sm:$0xff]  ;;  %v320_v48 = vadd.s32 4294967288, %v315_v45  ;;  %v327_v49 = vadd.s32 4294967280, %v315_v45  ;;  %p1368_p3 = scmp.ne.s32.totalorder %s1835_s7, %s1367_s21  ;;  %s1444_s23 = smov [#allocation7]  }
  0x4f   : > { %266 = vadd.xlane.f32.xlu1 %v265_v10  ;;  %1222 = vmatpush3.msra.mxu0 %v417_v33  ;;  %v334_v51 = vadd.s32 4294967272, %v315_v45  ;;  %v318_v53 = vsub.s32 %v315_v45, %v1684_v47  ;;  %vm412_vm6 = vcmask 1041408   ;;  %vm418_vm7 = vcmask 261120   ;;  %s1371_s5 = sshll.u32 %s1444_s23, 4  ;;  %s1372_s5 = int_to_ptr.vmem [resolvable:$false] %s1371_s5 }
  0x50   : > { %254 = vadd.xlane.f32.xlu0 %v253_v11  ;;  %1223 = vmatprep.subr.mxu0 %v1441_v32  ;;  %v323_v54 = vsub.s32 %v320_v48, %v1684_v47  ;;  %v330_v56 = vsub.s32 %v327_v49, %v1684_v47  ;;  %vm494_vm8 = vcmask 15360   ;;  %p1369_p7 = pnand %p1368_p3, %p1910_p11  ;;  %s1373_s6 = scalar_lea.vmem %s1372_s5, 4096 }
  0x51   : > { %1224 = vmatpush3.msra.mxu0 %v416_v34  ;;  %v337_v63 = vsub.s32 %v334_v51, %v1684_v47  ;;  %p1374_p10 = scmp.lt.s32.totalorder %s1835_s7, %s1372_s5  ;;  %p1375_p12 = scmp.lt.s32.totalorder %s1373_s6, %s1367_s21 }
  0x52   : > { %1225 = vmatprep.subr.mxu0 %v1441_v32  ;;  %p1370_p9 = pneg %p1369_p7 }
  0x53   : > { %269 = vadd.xlane.f32.xlu1 %v268_v16  ;;  %1226 = vmatpush3.msra.mxu0 %v415_v35  ;;  %p1376_p13 = por %p1375_p12, %p1374_p10 }
  0x54   : > { %257 = vadd.xlane.f32.xlu0 %v256_v17  ;;  %1227 = vmatprep.subr.mxu0 %v1441_v32 }
  0x55   : > { %1228 = vmatpush3.msra.mxu0 %v414_v36  ;;  %p1377_p0 = pnand %p1376_p13, %p1370_p9 }
  0x57   : > { %272 = vadd.xlane.f32.xlu1 %v271_v22 }
  0x58   : > { %260 = vadd.xlane.f32.xlu0 %v259_v23 }
  0x5b   : > { %286 = vmax.xlane.f32.xlu1 %v285_v24 }
  0x5c   : > { %283 = vmax.xlane.f32.xlu0 %v282_v25 }
  0x5f   : > { %298 = vmax.xlane.f32.xlu1 %v297_v26 }
  0x60   : > { %295 = vmax.xlane.f32.xlu0 %v294_v27 }
  0x63   : > { %301 = vmax.xlane.f32.xlu1 %v300_v28 }
  0x64   : > { %289 = vmax.xlane.f32.xlu0 %v288_v29 }
  0x67   : > { %304 = vmax.xlane.f32.xlu1 %v303_v30 }
  0x68   : > { %292 = vmax.xlane.f32.xlu0 %v291_v31 }
  0xd4   : > { %v264_v37 = vpop.xlane.xlu1 %263 }
  0xd5   : > { %v252_v38 = vpop.xlane.xlu0 %251  ;;  %v278_v57 = vmul.f32 0.00390625, %v264_v37 }
  0xd6   : > { %v274_v58 = vmul.f32 0.00390625, %v252_v38 }
  0xd7   : > { %v344_v16 = vrot.slane %v278_v57, %v318_v53 }
  0xd8   : > { %v267_v39 = vpop.xlane.xlu1 %266  ;;  %v319_v17 = vrot.slane %v274_v58, %v318_v53 }
  0xd9   : > { %v255_v40 = vpop.xlane.xlu0 %254  ;;  %v279_v55 = vmul.f32 0.00390625, %v267_v39 }
  0xda   : > { %v275_v59 = vmul.f32 0.00390625, %v255_v40 }
  0xdb   : > { %v348_v11 = vrot.slane %v279_v55, %v323_v54  ;;  %v493_v55 = vld [vmem:[%s1892_s2] sm:$0x3] }
  0xdc   : > { %v270_v41 = vpop.xlane.xlu1 %269  ;;  %v324_v22 = vrot.slane %v275_v59, %v323_v54  ;;  %1233 = vmatpush3.msk.msra.mxu1 %vm412_vm6, %v493_v55  ;;  %v808_v59 = vld [vmem:[#allocation5 + $0x2f8] sm:$0xff]  ;;  %v786_v55 = vld [vmem:[#allocation5 + $0x248] sm:$0xff] }
  0xdd   : > { %v258_v43 = vpop.xlane.xlu0 %257  ;;  %v280_v60 = vmul.f32 0.00390625, %v270_v41  ;;  %v349_v34 = vsel %vm325_vm1, %v348_v11, %v344_v16  ;;  %849 = vmatprep.subr.mxu1 %v808_v59  ;;  %v803_v11 = vld [vmem:[#allocation5 + $0x2d0] sm:$0xff]  ;;  %v740_v16 = vld [vmem:[#allocation5 + $0xe0] sm:$0xff]  ;;  %v784_v59 = vld [vmem:[#allocation5 + $0x238] sm:$0xff] }
  0xde   : > { %v276_v62 = vmul.f32 0.00390625, %v258_v43  ;;  %v326_v36 = vsel %vm325_vm1, %v324_v22, %v319_v17  ;;  %v739_v17 = vld [vmem:[#allocation5 + $0xd8] sm:$0xff]  ;;  %v802_v22 = vld [vmem:[#allocation5 + $0x2c8] sm:$0xff] }
  0xdf   : > { %v353_v23 = vrot.slane %v280_v60, %v330_v56  ;;  %v807_v60 = vld [vmem:[#allocation5 + $0x2f0] sm:$0xff] }
  0xe0   : > { %v273_v44 = vpop.xlane.xlu1 %272  ;;  %v331_v25 = vrot.slane %v276_v62, %v330_v56  ;;  %v743_v62 = vld [vmem:[#allocation5 + $0xf8] sm:$0xff] }
  0xe1   : > { %v261_v46 = vpop.xlane.xlu0 %260  ;;  %v281_v3 = vmul.f32 0.00390625, %v273_v44  ;;  %v354_v37 = vsel %vm332_vm2, %v353_v23, %v349_v34  ;;  %928 = vmatprep.subr.mxu0 %v743_v62  ;;  %v738_v23 = vld [vmem:[#allocation5 + $0xd0] sm:$0xff]  ;;  %v796_v34 = vld [vmem:[#allocation5 + $0x298] sm:$0xff] }
  0xe2   : > { %v277_v10 = vmul.f32 0.00390625, %v261_v46  ;;  %v333_v39 = vsel %vm332_vm2, %v331_v25, %v326_v36  ;;  %v737_v25 = vld [vmem:[#allocation5 + $0xc8] sm:$0xff]  ;;  %v795_v36 = vld [vmem:[#allocation5 + $0x290] sm:$0xff]  ;;  %v719_v62 = vld [vmem:[#allocation5 + $0x38] sm:$0xff] }
  0xe3   : > { %v358_v26 = vrot.slane %v281_v3, %v337_v63  ;;  %v742_v3 = vld [vmem:[#allocation5 + $0xf0] sm:$0xff] }
  0xe4   : > { %v287_v50 = vpop.xlane.xlu1 %286  ;;  %v338_v30 = vrot.slane %v277_v10, %v337_v63  ;;  %v741_v10 = vld [vmem:[#allocation5 + $0xe8] sm:$0xff] }
  0xe5   : > { %v284_v52 = vpop.xlane.xlu0 %283  ;;  %v378_v31 = vrot.slane %v287_v50, %v323_v54  ;;  %v359_v40 = vsel %vm339_vm3, %v358_v26, %v354_v37  ;;  %v800_v26 = vld [vmem:[#allocation5 + $0x2b8] sm:$0xff] }
  0xe6   : > { %v374_v32 = vrot.slane %v284_v52, %v318_v53  ;;  %v340_v44 = vsel %vm339_vm3, %v338_v30, %v333_v39  ;;  %v798_v30 = vld [vmem:[#allocation5 + $0x2a8] sm:$0xff]  ;;  %v731_v37 = vld [vmem:[#allocation5 + $0x98] sm:$0xff]  ;;  %v730_v39 = vld [vmem:[#allocation5 + $0x90] sm:$0xff] }
  0xe7   : > { %v361_v52 = vsel %vm360_vm4, %v359_v40, %v340_v44  ;;  %v793_v40 = vld [vmem:[#allocation5 + $0x280] sm:$0xff]  ;;  %v791_v44 = vld [vmem:[#allocation5 + $0x270] sm:$0xff] }
  0xe8   : > { %v299_v61 = vpop.xlane.xlu1 %298  ;;  %v379_v45 = vsel %vm325_vm1, %v378_v31, %v374_v32  ;;  %v734_v31 = vld [vmem:[#allocation5 + $0xb0] sm:$0xff]  ;;  %v797_v32 = vld [vmem:[#allocation5 + $0x2a0] sm:$0xff] }
  0xe9   : > { %v296_v7 = vpop.xlane.xlu0 %295  ;;  %v397_v27 = vrot.slane %v299_v61, %v323_v54  ;;  %v806_v61 = vld [vmem:[#allocation5 + $0x2e8] sm:$0xff] }
  0xea   : > { %v393_v28 = vrot.slane %v296_v7, %v318_v53  ;;  %v804_v7 = vld [vmem:[#allocation5 + $0x2d8] sm:$0xff] }
  0xec   : > { %v302_v24 = vpop.xlane.xlu1 %301  ;;  %v398_v41 = vsel %vm325_vm1, %v397_v27, %v393_v28  ;;  %v736_v27 = vld [vmem:[#allocation5 + $0xc0] sm:$0xff]  ;;  %v799_v28 = vld [vmem:[#allocation5 + $0x2b0] sm:$0xff] }
  0xed   : > { %v290_v29 = vpop.xlane.xlu0 %289  ;;  %v402_v33 = vrot.slane %v302_v24, %v330_v56  ;;  %v801_v24 = vld [vmem:[#allocation5 + $0x2c0] sm:$0xff] }
  0xee   : > { %v383_v35 = vrot.slane %v290_v29, %v330_v56  ;;  %v735_v29 = vld [vmem:[#allocation5 + $0xb8] sm:$0xff] }
  0xef   : > { %v403_v46 = vsel %vm332_vm2, %v402_v33, %v398_v41  ;;  %v733_v33 = vld [vmem:[#allocation5 + $0xa8] sm:$0xff] }
  0xf0   : > { %v305_v38 = vpop.xlane.xlu1 %304  ;;  %v384_v49 = vsel %vm332_vm2, %v383_v35, %v379_v45  ;;  %v732_v35 = vld [vmem:[#allocation5 + $0xa0] sm:$0xff]  ;;  %v729_v41 = vld [vmem:[#allocation5 + $0x88] sm:$0xff]  ;;  %v727_v45 = vld [vmem:[#allocation5 + $0x78] sm:$0xff] }
  0xf1   : > { %v407_v42 = vrot.slane %v305_v38, %v337_v63  ;;  %v293_v43 = vpop.xlane.xlu0 %292  ;;  %v794_v38 = vld [vmem:[#allocation5 + $0x288] sm:$0xff] }
  0xf2   : > { %v388_v48 = vrot.slane %v293_v43, %v337_v63  ;;  %v805_v63 = vld [vmem:[#allocation5 + $0x2e0] sm:$0xff] }
  0xf3   : > { %v408_v50 = vsel %vm339_vm3, %v407_v42, %v403_v46  ;;  %v792_v42 = vld [vmem:[#allocation5 + $0x278] sm:$0xff]  ;;  %v728_v43 = vld [vmem:[#allocation5 + $0x80] sm:$0xff]  ;;  %v790_v46 = vld [vmem:[#allocation5 + $0x268] sm:$0xff] }
  0xf4   : > { %v389_v51 = vsel %vm339_vm3, %v388_v48, %v384_v49  ;;  %v726_v48 = vld [vmem:[#allocation5 + $0x70] sm:$0xff]  ;;  %v789_v49 = vld [vmem:[#allocation5 + $0x260] sm:$0xff] }
  0xf5   : > { %v410_v53 = vsel %vm409_vm5, %v408_v50, %v389_v51  ;;  %v725_v50 = vld [vmem:[#allocation5 + $0x68] sm:$0xff]  ;;  %v788_v51 = vld [vmem:[#allocation5 + $0x258] sm:$0xff] }
  0xf6   : > { %v413_v54 = vsel %vm412_vm6, %v361_v52, %v410_v53  ;;  %v724_v52 = vld [vmem:[#allocation5 + $0x60] sm:$0xff]  ;;  %v787_v53 = vld [vmem:[#allocation5 + $0x250] sm:$0xff] }
  0xf7   : > { %1230 = vmatmul.mubr.msk.f32.vlgmr.msra.gmra.mxu0 %vm418_vm7, %v413_v54  ;;  %v723_v54 = vld [vmem:[#allocation5 + $0x58] sm:$0xff] }
  0xf8   : > { %929 = vmatpush1.msra.mxu0 %v742_v3  ;;  %v718_v3 = vld [vmem:[#allocation5 + $0x30] sm:$0xff] }
  0xf9   : > { %930 = vmatprep.subr.mxu0 %v741_v10  ;;  %v717_v10 = vld [vmem:[#allocation5 + $0x28] sm:$0xff] }
  0xfa   : > { %931 = vmatpush1.msra.mxu0 %v740_v16  ;;  %v716_v16 = vld [vmem:[#allocation5 + $0x20] sm:$0xff] }
  0xfb   : > { %932 = vmatprep.subr.mxu0 %v739_v17  ;;  %v779_v17 = vld [vmem:[#allocation5 + $0x210] sm:$0xff] }
  0xfc   : > { %933 = vmatpush1.msra.mxu0 %v738_v23 }
  0xfd   : > { %934 = vmatprep.subr.mxu0 %v737_v25 }
  0xfe   : > { %935 = vmatpush1.msra.mxu0 %v736_v27 }
  0xff   : > { %936 = vmatprep.subr.mxu0 %v735_v29  ;;  %v778_v29 = vld [vmem:[#allocation5 + $0x208] sm:$0xff] }
 0x100   : > { %937 = vmatpush1.msra.mxu0 %v734_v31  ;;  %v777_v31 = vld [vmem:[#allocation5 + $0x200] sm:$0xff] }
 0x101   : > { %938 = vmatprep.subr.mxu0 %v733_v33  ;;  %v840_v33 = vld [vmem:[#allocation5 + $0x3f8] sm:$0xff] }
 0x102   : > { %939 = vmatpush1.msra.mxu0 %v732_v35  ;;  %v839_v35 = vld [vmem:[#allocation5 + $0x3f0] sm:$0xff] }
 0x103   : > { %940 = vmatprep.subr.mxu0 %v731_v37  ;;  %v838_v37 = vld [vmem:[#allocation5 + $0x3e8] sm:$0xff] }
 0x104   : > { %941 = vmatpush1.msra.mxu0 %v730_v39  ;;  %v837_v39 = vld [vmem:[#allocation5 + $0x3e0] sm:$0xff] }
 0x105   : > { %942 = vmatprep.subr.mxu0 %v729_v41  ;;  %v836_v41 = vld [vmem:[#allocation5 + $0x3d8] sm:$0xff] }
 0x106   : > { %943 = vmatpush1.msra.mxu0 %v728_v43  ;;  %v835_v43 = vld [vmem:[#allocation5 + $0x3d0] sm:$0xff] }
 0x107   : > { %944 = vmatprep.subr.mxu0 %v727_v45  ;;  %v1708_v45 = vsub.s32 0, %v1684_v47 }
 0x108   : > { %945 = vmatpush1.msra.mxu0 %v726_v48  ;;  %v771_v48 = vld [vmem:[#allocation5 + $0x1d8] sm:$0xff] }
 0x109   : > { %946 = vmatprep.subr.mxu0 %v725_v50  ;;  %v770_v50 = vld [vmem:[#allocation5 + $0x1d0] sm:$0xff] }
 0x10a   : > { %947 = vmatpush1.msra.mxu0 %v724_v52  ;;  %v832_v52 = vld [vmem:[#allocation5 + $0x3b8] sm:$0xff] }
 0x10b   : > { %948 = vmatprep.subr.mxu0 %v723_v54 }
 0x1b7   : > { %v488_v56 = vpop.f32.mrf.mxu0 }
 0x1b8   : > { %v492_v57 = vmax.f32 %v488_v56, 0.0  ;;  %v722_v56 = vld [vmem:[#allocation5 + $0x50] sm:$0xff] }
 0x1b9   : > { %v1231_v58 = vpop.f32.mrf.mxu0  ;;  %949 = vmatpush1.msra.mxu0 %v722_v56  ;;  %v831_v56 = vld [vmem:[#allocation5 + $0x3b0] sm:$0xff] }
 0x1ba   : > { %1235 = vmatmul.mubr.msk.f32.vlgmr.msra.gmra.mxu1 %vm494_vm8, %v492_v57  ;;  %v785_v57 = vld [vmem:[#allocation5 + $0x240] sm:$0xff]  ;;  %v721_v58 = vld [vmem:[#allocation5 + $0x48] sm:$0xff] }
 0x1bb   : > { %850 = vmatpush1.msra.mxu1 %v807_v60  ;;  %v720_v60 = vld [vmem:[#allocation5 + $0x40] sm:$0xff]  ;;  %950 = vmatprep.subr.mxu0 %v721_v58  ;;  %v830_v58 = vld [vmem:[#allocation5 + $0x3a8] sm:$0xff] }
 0x1bc   : > { %851 = vmatprep.subr.mxu1 %v806_v61  ;;  %v783_v61 = vld [vmem:[#allocation5 + $0x230] sm:$0xff]  ;;  %951 = vmatpush1.msra.mxu0 %v720_v60  ;;  %v829_v60 = vld [vmem:[#allocation5 + $0x3a0] sm:$0xff] }
 0x1bd   : > { %852 = vmatpush1.msra.mxu1 %v805_v63  ;;  %v782_v63 = vld [vmem:[#allocation5 + $0x228] sm:$0xff]  ;;  %952 = vmatprep.subr.mxu0 %v719_v62  ;;  %v828_v62 = vld [vmem:[#allocation5 + $0x398] sm:$0xff] }
 0x1be   : > { %853 = vmatprep.subr.mxu1 %v804_v7  ;;  %v781_v7 = vld [vmem:[#allocation5 + $0x220] sm:$0xff]  ;;  %953 = vmatpush1.msra.mxu0 %v718_v3 }
 0x1bf   : > { %854 = vmatpush1.msra.mxu1 %v803_v11  ;;  %v780_v11 = vld [vmem:[#allocation5 + $0x218] sm:$0xff]  ;;  %954 = vmatprep.subr.mxu0 %v717_v10  ;;  %v764_v10 = vld [vmem:[#allocation5 + $0x1a0] sm:$0xff] }
 0x1c0   : > { %855 = vmatprep.subr.mxu1 %v802_v22  ;;  %955 = vmatpush1.msra.mxu0 %v716_v16  ;;  %v763_v16 = vld [vmem:[#allocation5 + $0x198] sm:$0xff] }
 0x1c1   : > { %856 = vmatpush1.msra.mxu1 %v801_v24 }
 0x1c2   : > { %857 = vmatprep.subr.mxu1 %v800_v26 }
 0x1c3   : > { %858 = vmatpush1.msra.mxu1 %v799_v28 }
 0x1c4   : > { %859 = vmatprep.subr.mxu1 %v798_v30  ;;  %v715_v30 = vld [vmem:[#allocation5 + $0x18] sm:$0xff] }
 0x1c5   : > { %860 = vmatpush1.msra.mxu1 %v797_v32  ;;  %956 = vmatprep.subr.mxu0 %v715_v30  ;;  %v714_v32 = vld [vmem:[#allocation5 + $0x10] sm:$0xff] }
 0x1c6   : > { %861 = vmatprep.subr.mxu1 %v796_v34  ;;  %957 = vmatpush1.msra.mxu0 %v714_v32  ;;  %v713_v34 = vld [vmem:[#allocation5 + $0x8] sm:$0xff]  ;;  %v758_v30 = vld [vmem:[#allocation5 + $0x170] sm:$0xff] }
 0x1c7   : > { %862 = vmatpush1.msra.mxu1 %v795_v36  ;;  %958 = vmatprep.subr.mxu0 %v713_v34  ;;  %v712_v36 = vld [vmem:[#allocation5] sm:$0xff]  ;;  %v757_v32 = vld [vmem:[#allocation5 + $0x168] sm:$0xff] }
 0x1c8   : > { %863 = vmatprep.subr.mxu1 %v794_v38  ;;  %959 = vmatpush1.msra.mxu0 %v712_v36  ;;  %v775_v38 = vld [vmem:[#allocation5 + $0x1f8] sm:$0xff]  ;;  %v756_v34 = vld [vmem:[#allocation5 + $0x160] sm:$0xff] }
 0x1c9   : > { %864 = vmatpush1.msra.mxu1 %v793_v40  ;;  %960 = vmatprep.subr.mxu0 %v775_v38  ;;  %v774_v40 = vld [vmem:[#allocation5 + $0x1f0] sm:$0xff]  ;;  %v755_v36 = vld [vmem:[#allocation5 + $0x158] sm:$0xff] }
 0x1ca   : > { %865 = vmatprep.subr.mxu1 %v792_v42  ;;  %961 = vmatpush2.msra.mxu0 %v774_v40  ;;  %v773_v42 = vld [vmem:[#allocation5 + $0x1e8] sm:$0xff]  ;;  %v754_v38 = vld [vmem:[#allocation5 + $0x150] sm:$0xff] }
 0x1cb   : > { %866 = vmatpush1.msra.mxu1 %v791_v44  ;;  %962 = vmatprep.subr.mxu0 %v773_v42  ;;  %v772_v44 = vld [vmem:[#allocation5 + $0x1e0] sm:$0xff]  ;;  %v753_v40 = vld [vmem:[#allocation5 + $0x148] sm:$0xff] }
 0x1cc   : > { %867 = vmatprep.subr.mxu1 %v790_v46  ;;  %963 = vmatpush2.msra.mxu0 %v772_v44  ;;  %v834_v46 = vld [vmem:[#allocation5 + $0x3c8] sm:$0xff]  ;;  %v752_v42 = vld [vmem:[#allocation5 + $0x140] sm:$0xff]  ;;  %v751_v44 = vld [vmem:[#allocation5 + $0x138] sm:$0xff] }
 0x1cd   : > { %868 = vmatpush1.msra.mxu1 %v789_v49  ;;  %964 = vmatprep.subr.mxu0 %v771_v48  ;;  %v833_v49 = vld [vmem:[#allocation5 + $0x3c0] sm:$0xff]  ;;  %v750_v48 = vld [vmem:[#allocation5 + $0x130] sm:$0xff] }
 0x1ce   : > { %869 = vmatprep.subr.mxu1 %v788_v51  ;;  %965 = vmatpush2.msra.mxu0 %v770_v50  ;;  %v749_v50 = vld [vmem:[#allocation5 + $0x128] sm:$0xff] }
 0x1cf   : > { %870 = vmatpush1.msra.mxu1 %v787_v53  ;;  %v769_v53 = vld [vmem:[#allocation5 + $0x1c8] sm:$0xff] }
 0x1d0   : > { %871 = vmatprep.subr.mxu1 %v786_v55  ;;  %v1712_v55 = vsub.s32 1, %v1684_v47  ;;  %966 = vmatprep.subr.mxu0 %v769_v53  ;;  %v810_v53 = vld [vmem:[#allocation5 + $0x308] sm:$0xff] }
 0x1d1   : > { %872 = vmatpush1.msra.mxu1 %v785_v57  ;;  %v768_v57 = vld [vmem:[#allocation5 + $0x1c0] sm:$0xff] }
 0x1d2   : > { %873 = vmatprep.subr.mxu1 %v784_v59  ;;  %967 = vmatpush2.msra.mxu0 %v768_v57  ;;  %v767_v59 = vld [vmem:[#allocation5 + $0x1b8] sm:$0xff]  ;;  %v746_v57 = vld [vmem:[#allocation5 + $0x110] sm:$0xff] }
 0x1d3   : > { %874 = vmatpush1.msra.mxu1 %v783_v61  ;;  %v766_v61 = vld [vmem:[#allocation5 + $0x1b0] sm:$0xff]  ;;  %968 = vmatprep.subr.mxu0 %v767_v59  ;;  %v744_v59 = vld [vmem:[#allocation5 + $0x100] sm:$0xff] }
 0x1d4   : > { %875 = vmatprep.subr.mxu1 %v782_v63  ;;  %v765_v63 = vld [vmem:[#allocation5 + $0x1a8] sm:$0xff]  ;;  %969 = vmatpush2.msra.mxu0 %v766_v61 }
 0x1d5   : > { %876 = vmatpush1.msra.mxu1 %v781_v7  ;;  %v827_v7 = vld [vmem:[#allocation5 + $0x390] sm:$0xff]  ;;  %970 = vmatprep.subr.mxu0 %v765_v63 }
 0x1d6   : > { %877 = vmatprep.subr.mxu1 %v780_v11  ;;  %v826_v11 = vld [vmem:[#allocation5 + $0x388] sm:$0xff]  ;;  %971 = vmatpush2.msra.mxu0 %v764_v10 }
 0x1d7   : > { %878 = vmatpush1.msra.mxu1 %v779_v17  ;;  %v825_v17 = vld [vmem:[#allocation5 + $0x380] sm:$0xff]  ;;  %972 = vmatprep.subr.mxu0 %v763_v16 }
 0x1d8   : > { %879 = vmatprep.subr.mxu1 %v778_v29  ;;  %v821_v29 = vld [vmem:[#allocation5 + $0x360] sm:$0xff] }
 0x1d9   : > { %880 = vmatpush1.msra.mxu1 %v777_v31  ;;  %v820_v31 = vld [vmem:[#allocation5 + $0x358] sm:$0xff] }
 0x1da   : > { %881 = vmatprep.subr.mxu1 %v840_v33  ;;  %v819_v33 = vld [vmem:[#allocation5 + $0x350] sm:$0xff] }
 0x1db   : > { %882 = vmatpush2.msra.mxu1 %v839_v35  ;;  %v818_v35 = vld [vmem:[#allocation5 + $0x348] sm:$0xff] }
 0x1dc   : > { %883 = vmatprep.subr.mxu1 %v838_v37  ;;  %v817_v37 = vld [vmem:[#allocation5 + $0x340] sm:$0xff] }
 0x1dd   : > { %884 = vmatpush2.msra.mxu1 %v837_v39  ;;  %v816_v39 = vld [vmem:[#allocation5 + $0x338] sm:$0xff] }
 0x1de   : > { %885 = vmatprep.subr.mxu1 %v836_v41  ;;  %v815_v41 = vld [vmem:[#allocation5 + $0x330] sm:$0xff] }
 0x1df   : > { %886 = vmatpush2.msra.mxu1 %v835_v43  ;;  %v814_v43 = vld [vmem:[#allocation5 + $0x328] sm:$0xff] }
 0x1e0   : > { %887 = vmatprep.subr.mxu1 %v834_v46  ;;  %v813_v46 = vld [vmem:[#allocation5 + $0x320] sm:$0xff] }
 0x1e1   : > { %888 = vmatpush2.msra.mxu1 %v833_v49  ;;  %v812_v49 = vld [vmem:[#allocation5 + $0x318] sm:$0xff] }
 0x1e2   : > { %889 = vmatprep.subr.mxu1 %v832_v52  ;;  %v748_v52 = vld [vmem:[#allocation5 + $0x120] sm:$0xff] }
 0x1e3   : > { %890 = vmatpush2.msra.mxu1 %v831_v56  ;;  %v809_v56 = vld [vmem:[#allocation5 + $0x300] sm:$0xff] }
 0x1e4   : > { %891 = vmatprep.subr.mxu1 %v830_v58  ;;  %v745_v58 = vld [vmem:[#allocation5 + $0x108] sm:$0xff] }
 0x1e5   : > { %892 = vmatpush2.msra.mxu1 %v829_v60 }
 0x1e6   : > { %893 = vmatprep.subr.mxu1 %v828_v62 }
 0x1e7   : > { %894 = vmatpush2.msra.mxu1 %v827_v7 }
 0x1e8   : > { %895 = vmatprep.subr.mxu1 %v826_v11 }
 0x1e9   : > { %896 = vmatpush2.msra.mxu1 %v825_v17 }
 0x27a   : > { %v567_v22 = vpop.f32.mrf.mxu1 }
 0x27b   : > { %v572_v23 = vrot.slane %v567_v22, 2 }
 0x27c   : > { %v1236_v24 = vpop.f32.mrf.mxu1 }
 0x27d   : > { %v574_v25 = vadd.f32 %v572_v23, %v567_v22  ;;  %v762_v22 = vld [vmem:[#allocation5 + $0x190] sm:$0xff]  ;;  %v824_v23 = vld [vmem:[#allocation5 + $0x378] sm:$0xff]  ;;  %v761_v24 = vld [vmem:[#allocation5 + $0x188] sm:$0xff] }
 0x27e   : > { %973 = vmatpush2.msra.mxu0 %v762_v22  ;;  %897 = vmatprep.subr.mxu1 %v824_v23 }
 0x27f   : > { %v1201_v26 = vmul.f32 -1.442695, %v574_v25  ;;  %v823_v25 = vld [vmem:[#allocation5 + $0x370] sm:$0xff]  ;;  %974 = vmatprep.subr.mxu0 %v761_v24 }
 0x280   : > { %898 = vmatpush2.msra.mxu1 %v823_v25 }
 0x281   : > { %1301 = vpow2.f32 %v1201_v26  ;;  %v760_v26 = vld [vmem:[#allocation5 + $0x180] sm:$0xff] }
 0x282   : > { %975 = vmatpush2.msra.mxu0 %v760_v26 }
 0x28e   : > { %v1302_v27 = vpop.eup %1301 }
 0x28f   : > { %v578_v28 = vadd.f32 1.0, %v1302_v27  ;;  %v822_v27 = vld [vmem:[#allocation5 + $0x368] sm:$0xff] }
 0x290   : > { %899 = vmatprep.subr.mxu1 %v822_v27 }
 0x291   : > { %1303 = vrcp.f32 %v578_v28  ;;  %v759_v28 = vld [vmem:[#allocation5 + $0x178] sm:$0xff]  ;;  %900 = vmatpush2.msra.mxu1 %v821_v29 }
 0x292   : > { %976 = vmatprep.subr.mxu0 %v759_v28  ;;  %901 = vmatprep.subr.mxu1 %v820_v31 }
 0x293   : > { %977 = vmatpush2.msra.mxu0 %v758_v30  ;;  %902 = vmatpush2.msra.mxu1 %v819_v33 }
 0x294   : > { %978 = vmatprep.subr.mxu0 %v757_v32  ;;  %903 = vmatprep.subr.mxu1 %v818_v35 }
 0x295   : > { %979 = vmatpush2.msra.mxu0 %v756_v34  ;;  %904 = vmatpush2.msra.mxu1 %v817_v37 }
 0x296   : > { %980 = vmatprep.subr.mxu0 %v755_v36  ;;  %905 = vmatprep.subr.mxu1 %v816_v39 }
 0x297   : > { %981 = vmatpush2.msra.mxu0 %v754_v38  ;;  %906 = vmatpush2.msra.mxu1 %v815_v41 }
 0x298   : > { %982 = vmatprep.subr.mxu0 %v753_v40  ;;  %907 = vmatprep.subr.mxu1 %v814_v43 }
 0x299   : > { %983 = vmatpush2.msra.mxu0 %v752_v42  ;;  %908 = vmatpush2.msra.mxu1 %v813_v46 }
 0x29a   : > { %984 = vmatprep.subr.mxu0 %v751_v44  ;;  %909 = vmatprep.subr.mxu1 %v812_v49 }
 0x29b   : > { %985 = vmatpush2.msra.mxu0 %v750_v48 }
 0x29c   : > { %986 = vmatprep.subr.mxu0 %v749_v50 }
 0x29d   : > { %987 = vmatpush2.msra.mxu0 %v748_v52 }
 0x29e   : > { %v1304_v51 = vpop.eup %1303 }
 0x29f   : > { %v584_v54 = vrot.slane %v1304_v51, %v1708_v45  ;;  %v603_v3 = vrot.slane %v1304_v51, %v1712_v55  ;;  %v811_v51 = vld [vmem:[#allocation5 + $0x310] sm:$0xff] }
 0x2a0   : > { %910 = vmatpush2.msra.mxu1 %v811_v51 }
 0x2a1   : > { %590 = vbcast.lane.b32.xlu1 %v584_v54, 264  ;;  %586 = vbcast.lane.b32.xlu0 %v584_v54, 256 }
 0x2a2   : > { %911 = vmatprep.subr.mxu1 %v810_v53 }
 0x2a3   : > { %912 = vmatpush2.msra.mxu1 %v809_v56 }
 0x2a5   : > { %605 = vbcast.lane.b32.xlu1 %v603_v3, 256  ;;  %594 = vbcast.lane.b32.xlu0 %v584_v54, 272 }
 0x2a9   : > { %609 = vbcast.lane.b32.xlu1 %v603_v3, 264  ;;  %598 = vbcast.lane.b32.xlu0 %v584_v54, 280  ;;  %v747_v54 = vld [vmem:[#allocation5 + $0x118] sm:$0xff] }
 0x2aa   : > { %988 = vmatprep.subr.mxu0 %v747_v54 }
 0x2ab   : > { %989 = vmatpush2.msra.mxu0 %v746_v57 }
 0x2ac   : > { %990 = vmatprep.subr.mxu0 %v745_v58 }
 0x2ad   : > { %613 = vbcast.lane.b32.xlu1 %v603_v3, 272  ;;  %991 = vmatpush2.msra.mxu0 %v744_v59 }
 0x2b1   : > { %617 = vbcast.lane.b32.xlu1 %v603_v3, 280 }
 0x313   : > { %v591_v60 = vpop.permute.xlu1 %590  ;;  %v587_v61 = vpop.permute.xlu0 %586 }
 0x314   : > { %v1716_v62 = vmul.f32 %v591_v60, %v1624_v8  ;;  %v1719_v63 = vmul.f32 %v591_v60, %v1626_v9  ;;  %v1722_v3 = vmul.f32 %v587_v61, %v1612_v2  ;;  %v1725_v7 = vmul.f32 %v587_v61, %v1616_v4 }
 0x316   : > { %v635_v8 = vadd.f32 %v1716_v62, %v1722_v3  ;;  %v644_v9 = vadd.f32 %v1719_v63, %v1725_v7  ;;  %v676_v2 = vmax.f32 %v1722_v3, %v1716_v62  ;;  %v685_v4 = vmax.f32 %v1725_v7, %v1719_v63 }
 0x317   : > { %v606_v10 = vpop.permute.xlu1 %605  ;;  %v595_v11 = vpop.permute.xlu0 %594 }
 0x318   : > { %v1728_v16 = vmul.f32 %v595_v11, %v1636_v14  ;;  %v1731_v17 = vmul.f32 %v595_v11, %v1638_v15 }
 0x31a   : > { %v636_v26 = vadd.f32 %v635_v8, %v1728_v16  ;;  %v645_v27 = vadd.f32 %v644_v9, %v1731_v17  ;;  %v677_v28 = vmax.f32 %v676_v2, %v1728_v16  ;;  %v686_v29 = vmax.f32 %v685_v4, %v1731_v17 }
 0x31b   : > { %v610_v22 = vpop.permute.xlu1 %609  ;;  %v599_v23 = vpop.permute.xlu0 %598 }
 0x31c   : > { %v1742_v14 = vmul.f32 %v610_v22, %v1618_v5  ;;  %v1745_v15 = vmul.f32 %v610_v22, %v1620_v6  ;;  %v1748_v24 = vmul.f32 %v599_v23, %v1648_v20  ;;  %v1751_v25 = vmul.f32 %v599_v23, %v1650_v21 }
 0x31d   : > { %v1758_v5 = vmul.f32 %v606_v10, %v1608_v0  ;;  %v1761_v6 = vmul.f32 %v606_v10, %v1610_v1 }
 0x31e   : > { %v637_v20 = vadd.f32 %v636_v26, %v1748_v24  ;;  %v646_v30 = vadd.f32 %v645_v27, %v1751_v25  ;;  %v678_v21 = vmax.f32 %v677_v28, %v1748_v24  ;;  %v687_v31 = vmax.f32 %v686_v29, %v1751_v25 }
 0x31f   : > { %v614_v32 = vpop.permute.xlu1 %613  ;;  %v653_v33 = vadd.f32 %v1742_v14, %v1758_v5  ;;  %v662_v34 = vadd.f32 %v1745_v15, %v1761_v6  ;;  %v694_v39 = vmax.f32 %v1758_v5, %v1742_v14  ;;  %v703_v40 = vmax.f32 %v1761_v6, %v1745_v15 }
 0x320   : > { %v1772_v0 = vmul.f32 %v614_v32, %v1632_v12  ;;  %v1775_v1 = vmul.f32 %v614_v32, %v1634_v13  ;;  %v638_v35 = vrot.slane %v637_v20, 4  ;;  %v647_v36 = vrot.slane %v646_v30, 4 }
 0x321   : > { %v679_v37 = vrot.slane %v678_v21, 4  ;;  %v688_v38 = vrot.slane %v687_v31, 4 }
 0x322   : > { %v654_v41 = vadd.f32 %v653_v33, %v1772_v0  ;;  %v663_v42 = vadd.f32 %v662_v34, %v1775_v1  ;;  %v639_v43 = vadd.f32 %v638_v35, %v637_v20  ;;  %v648_v12 = vadd.f32 %v647_v36, %v646_v30 }
 0x323   : > { %v680_v44 = vmax.f32 %v678_v21, %v679_v37  ;;  %v689_v46 = vmax.f32 %v687_v31, %v688_v38  ;;  %v618_v13 = vpop.permute.xlu1 %617  ;;  %v695_v48 = vmax.f32 %v694_v39, %v1772_v0  ;;  %v704_v49 = vmax.f32 %v703_v40, %v1775_v1 }
 0x324   : > { %v1786_v50 = vmul.f32 %v618_v13, %v1644_v18  ;;  %v1789_v51 = vmul.f32 %v618_v13, %v1646_v19  ;;  %v640_v52 = vrot.slane %v639_v43, 2  ;;  %v649_v53 = vrot.slane %v648_v12, 2 }
 0x325   : > { %v681_v54 = vrot.slane %v680_v44, 2  ;;  %v690_v56 = vrot.slane %v689_v46, 2 }
 0x326   : > { %v655_v57 = vadd.f32 %v654_v41, %v1786_v50  ;;  %v664_v58 = vadd.f32 %v663_v42, %v1789_v51  ;;  %v696_v59 = vmax.f32 %v695_v48, %v1786_v50  ;;  %v705_v60 = vmax.f32 %v704_v49, %v1789_v51 }
 0x327   : > { %v641_v61 = vadd.f32 %v640_v52, %v639_v43  ;;  %v650_v10 = vadd.f32 %v649_v53, %v648_v12  ;;  %v682_v19 = vmax.f32 %v680_v44, %v681_v54  ;;  %v691_v2 = vmax.f32 %v689_v46, %v690_v56 }
 0x328   : > { %v656_v11 = vrot.slane %v655_v57, 4  ;;  %v665_v18 = vrot.slane %v664_v58, 4  ;;  %v697_v8 = vrot.slane %v696_v59, 4  ;;  %v706_v9 = vrot.slane %v705_v60, 4 }
 0x329   : > { %v651_v27 = vrot.slane %v650_v10, 1  ;;  %v642_v28 = vrot.slane %v641_v61, 1  ;;  %v692_v31 = vrot.slane %v691_v2, 1  ;;  %v683_v32 = vrot.slane %v682_v19, 1 }
 0x32a   : > { %v657_v4 = vadd.f32 %v656_v11, %v655_v57  ;;  %v666_v22 = vadd.f32 %v665_v18, %v664_v58  ;;  %v698_v23 = vmax.f32 %v696_v59, %v697_v8  ;;  %v707_v26 = vmax.f32 %v705_v60, %v706_v9 }
 0x32b   : > { %v652_v37 = vadd.f32 %v651_v27, %v650_v10  ;;  %v643_v38 = vadd.f32 %v642_v28, %v641_v61  ;;  %v693_v43 = vmax.f32 %v691_v2, %v692_v31  ;;  %v684_v12 = vmax.f32 %v682_v19, %v683_v32 }
 0x32c   : > { %v658_v29 = vrot.slane %v657_v4, 2  ;;  %v667_v20 = vrot.slane %v666_v22, 2  ;;  %v699_v30 = vrot.slane %v698_v23, 2  ;;  %v708_v21 = vrot.slane %v707_v26, 2 }
 0x32d   : > { %v673_v49 = vmul.f32 0.03125, %v652_v37  ;;  %v672_v52 = vmul.f32 0.03125, %v643_v38 }
 0x32e   : > { %v659_v33 = vadd.f32 %v658_v29, %v657_v4  ;;  %v700_v34 = vmax.f32 %v698_v23, %v699_v30  ;;  %v709_v35 = vmax.f32 %v707_v26, %v708_v21  ;;  %v668_v36 = vadd.f32 %v667_v20, %v666_v22 }
 0x32f   : > { %v1443_v26 = vmov 1966171168  }
 0x330   : > { %v710_v39 = vrot.slane %v709_v35, 1  ;;  %v701_v40 = vrot.slane %v700_v34, 1  ;;  %v669_v41 = vrot.slane %v668_v36, 1  ;;  %v660_v42 = vrot.slane %v659_v33, 1 }
 0x331   : > { %v1015_v27 = vunpack.c.l.s4 %v1443_v26 }
 0x332   : > { %v711_v44 = vmax.f32 %v709_v35, %v710_v39  ;;  %v702_v46 = vmax.f32 %v700_v34, %v701_v40  ;;  %v670_v13 = vadd.f32 %v669_v41, %v668_v36  ;;  %v661_v48 = vadd.f32 %v660_v42, %v659_v33 }
 0x333   : > { %v1016_v28 = vunpack.c.0.s8 %v1015_v27 }
 0x334   : > { %v846_v53 = vsel %vm360_vm4, %v711_v44, %v693_v43  ;;  %v845_v54 = vsel %vm360_vm4, %v702_v46, %v684_v12  ;;  %v675_v56 = vmul.f32 0.03125, %v670_v13  ;;  %v674_v57 = vmul.f32 0.03125, %v661_v48 }
 0x335   : > { %913 = vmatprep.mubr.f32.mxu1 %v846_v53  ;;  %v1019_v20 = vsub.s32 %v1016_v28, %v1684_v47 }
 0x336   : > { %914 = vmatmul.mubr.f32.vlgmr.msra.gmra.mxu1 %v845_v54  ;;  %v925_v58 = vsel %vm360_vm4, %v675_v56, %v673_v49  ;;  %v924_v59 = vsel %vm360_vm4, %v674_v57, %v672_v52 }
 0x337   : > { %992 = vmatprep.mubr.f32.mxu0 %v925_v58 }
 0x338   : > { %993 = vmatmul.mubr.f32.vlgmr.msra.gmra.mxu0 %v924_v59 }
 0x3f6   : > { %v915_v60 = vpop.f32.mrf.mxu1 }
 0x3f8   : > { %v994_v61 = vpop.f32.mrf.mxu0  ;;  %v917_v11 = vpop.f32.mrf.mxu1 }
 0x3f9   : > { %v995_v10 = vadd.f32 %v994_v61, %v915_v60 }
 0x3fa   : > { %v996_v18 = vpop.f32.mrf.mxu0 }
 0x3fb   : > { %v1202_v8 = vmul.f32 -1.442695, %v995_v10  ;;  %v997_v9 = vadd.f32 %v996_v18, %v917_v11 }
 0x3fd   : > { %1305 = vpow2.f32 %v1202_v8  ;;  %v1203_v19 = vmul.f32 -1.442695, %v997_v9 }
 0x3ff   : > { %1307 = vpow2.f32 %v1203_v19 }
 0x40a   : > { %v1306_v2 = vpop.eup %1305 }
 0x40b   : > { %v1005_v4 = vadd.f32 1.0, %v1306_v2 }
 0x40c   : > { %v1308_v22 = vpop.eup %1307 }
 0x40d   : > { %v1006_v23 = vadd.f32 1.0, %v1308_v22  ;;  %1309 = vrcp.f32 %v1005_v4 }
 0x40f   : > { %1311 = vrcp.f32 %v1006_v23 }
 0x41a   : > { %v1310_v29 = vpop.eup %1309 }
 0x41c   : > { %v1312_v30 = vpop.eup %1311 }
 0x41d   : > { %v1013_v21 = vcombine.low %v1310_v29, %v1312_v30 }
 0x41f   : > { %v1020_v31 = vrot.slane %v1013_v21, %v1019_v20 }
 0x421   : > { %v1021_v32 = vcombine.high %v1020_v31, %v1020_v31  ;;  %v1028_v33 = vrot.slane %v1020_v31, %v1019_v20 }
 0x423   : > { %v1035_v34 = vrot.slane %v1021_v32, %v1019_v20  ;;  %v1039_v35 = vrot.slane %v1028_v33, %v1708_v45  ;;  %v1043_v36 = vrot.slane %v1028_v33, %v1712_v55 }
 0x425   : > { %v1047_v37 = vrot.slane %v1035_v34, %v1708_v45  ;;  %v1051_v38 = vrot.slane %v1035_v34, %v1712_v55  ;;  %v1056_v39 = vmul.f32 %v1039_v35, %v1722_v3  ;;  %v1057_v40 = vmul.f32 %v1043_v36, %v1725_v7 }
 0x426   : > { %v1058_v47 = vmul.f32 %v1039_v35, %v1716_v62  ;;  %v1059_v45 = vmul.f32 %v1043_v36, %v1719_v63  ;;  %v1060_v55 = vmul.f32 %v1039_v35, %v1728_v16  ;;  %v1061_v3 = vmul.f32 %v1043_v36, %v1731_v17 }
 0x427   : > { %v1062_v7 = vmul.f32 %v1039_v35, %v1748_v24  ;;  %v1063_v41 = vmul.f32 %v1043_v36, %v1751_v25  ;;  %v1064_v42 = vmul.f32 %v1047_v37, %v1758_v5  ;;  %v1065_v43 = vmul.f32 %v1051_v38, %v1761_v6  ;;  %1072 = vst [vmem:[%s1809_s25] sm:$0xff] %v1056_v39 }
 0x428   : > { %1073 = vst [vmem:[%s1809_s25 + $0x8] sm:$0xff] %v1057_v40  ;;  %v1066_v62 = vmul.f32 %v1047_v37, %v1742_v14  ;;  %v1067_v63 = vmul.f32 %v1051_v38, %v1745_v15  ;;  %v1068_v16 = vmul.f32 %v1047_v37, %v1772_v0  ;;  %v1069_v17 = vmul.f32 %v1051_v38, %v1775_v1 }
 0x429   : > { %1074 = vst [vmem:[%s1809_s25 + $0x10] sm:$0xff] %v1058_v47  ;;  %1075 = vst [vmem:[%s1809_s25 + $0x18] sm:$0xff] %v1059_v45  ;;  %v1070_v14 = vmul.f32 %v1047_v37, %v1786_v50  ;;  %v1071_v15 = vmul.f32 %v1051_v38, %v1789_v51 }
 0x42a   : > { %1076 = vst [vmem:[%s1809_s25 + $0x20] sm:$0xff] %v1060_v55  ;;  %1077 = vst [vmem:[%s1809_s25 + $0x28] sm:$0xff] %v1061_v3 }
 0x42b   : > { %1078 = vst [vmem:[%s1809_s25 + $0x30] sm:$0xff] %v1062_v7  ;;  %1079 = vst [vmem:[%s1809_s25 + $0x38] sm:$0xff] %v1063_v41 }
 0x42c   : > { %1080 = vst [vmem:[%s1809_s25 + $0x40] sm:$0xff] %v1064_v42  ;;  %1081 = vst [vmem:[%s1809_s25 + $0x48] sm:$0xff] %v1065_v43 }
 0x42d   : > { %1082 = vst [vmem:[%s1809_s25 + $0x50] sm:$0xff] %v1066_v62  ;;  %1083 = vst [vmem:[%s1809_s25 + $0x58] sm:$0xff] %v1067_v63 }
 0x42e   : > { %1084 = vst [vmem:[%s1809_s25 + $0x60] sm:$0xff] %v1068_v16  ;;  %1085 = vst [vmem:[%s1809_s25 + $0x68] sm:$0xff] %v1069_v17 }
 0x42f   : > { %1086 = vst [vmem:[%s1809_s25 + $0x70] sm:$0xff] %v1070_v14  ;;  %1087 = vst [vmem:[%s1809_s25 + $0x78] sm:$0xff] %v1071_v15 }
 0x430   : > { %1380 = shalt.err (!%p1377_p0)
}
 0x431   : > { %s1381_s24 = scalar_lea.hbm %s1833_s12, 2048  ;;  %s1385_s13 = scalar_lea.hbm %s1894_s4, 4096 }
 0x432   : > { %p1382_p5 = scmp.ne.s32.totalorder %s1833_s12, %s1381_s24  ;;  %p1386_p4 = scmp.lt.s32.totalorder %s1833_s12, %s1894_s4 }
 0x433   : > { %p1387_p6 = scmp.lt.s32.totalorder %s1385_s13, %s1381_s24 }
 0x434   : > { %p1383_p2 = pnand %p1382_p5, %p1910_p11 }
 0x435   : > { %p1388_p8 = por %p1387_p6, %p1386_p4 }
 0x436   : > { %p1384_p1 = pneg %p1383_p2 }
 0x438   : > { %p1389_p3 = pnand %p1388_p8, %p1384_p1 }
 0x43a   : > { %1392 = shalt.err (!%p1389_p3)
}
 0x43b   : > { %s1445_s20 = smov 256   ;;  %s1446_s25 = smov 16  }
 0x43c   : > { %1243 = dma.vmem_to_hbm [thread:$0]  (%p1910_p11), %s1835_s7, 2048, %s1833_s12, %s1089_s28, %s1445_s20, %s1445_s20, %s1446_s25  }
 0x43d PF: > { %s1118_s19 = sand.u32 1, %s1423_s15   ;;  %p1911_p7 = scmp.ne.s32.totalorder %s1900_s22, 0 }
 0x43e   : > { %p1912_p9 = scmp.ge.s32.totalorder %s1435_s18, 2  ;;  %s1119_s8 = scalar_lea.sflag [#allocation4], %s1118_s19 }
 0x440   : > { %p1254_p10 = pnand %p1912_p9, %p1911_p7 }
 0x442   : > { %p1255_p12 = pneg %p1254_p10 }
 0x444   : > { %1418 = dma.done.wait (%p1255_p12), %s1119_s8, 2048  }
 0x445   : > { %1420 = vsyncadd (%p1255_p12), %s1119_s8, 4294965248  ;;  %p18_p13 = scmp.ge.s32.totalorder %s1526_s27, 4   ;;  %s1913_s15 = smov %s1427_s16 }
 0x446   : > { %s1914_s16 = smov %s1431_s17  ;;  %s1915_s17 = smov %s1546_s9 }
 0x447   : > { %s1916_s18 = smov %s1526_s27  ;;  %20 = sbr.rel (!%p18_p13) target bundleno = 6 (0x6), region = 86 }
 0x44c   :  { %1124 = vsyncpa [#allocation3], 1 }
 0x44d   :  { %1126 = vsyncpa [#allocation3 + $0x1], 1 }
 0x44e   :  { %1127 = vsyncpa [#allocation6], 1 }
 0x44f   :  { %1128 = vsyncpa [#allocation4], 1 }
 0x450   :  { %1130 = vsyncpa [#allocation4 + $0x1], 1 }

</bundles_post_ra>
